<compile_context>
chip_gen: v5e
topology: v5e:2x2
jax: 0.10.0
libtpu: 0.0.40
codegen_flags: <defaults>
</compile_context>

<pallas_src>
import functools

import jax
import jax.numpy as jnp
from jax.experimental import pallas as pl
from jax.experimental.pallas import tpu as pltpu


def _lstm_kernel(
    x_ref,        # (T_CHUNK, B, I)  input chunk for this grid step
    wh_ref,       # (H, 4H)          fused hidden-part weights  [f|i|o|c]
    wx_ref,       # (I, 4H)          fused input-part weights   [f|i|o|c]
    b_ref,        # (1, 4H)          fused bias                 [f|i|o|c]
    out_ref,      # (T_CHUNK, B, H)  output chunk
    h_ref,        # (B, H)           hidden state (constant index_map -> resident)
    c_ref,        # (B, H)           cell   state (constant index_map -> resident)
    *,
    t_chunk,
    hidden_size,
):
    H = hidden_size

    @pl.when(pl.program_id(0) == 0)
    def _():
        h_ref[...] = jnp.zeros_like(h_ref)
        c_ref[...] = jnp.zeros_like(c_ref)

    # Weights stay in VMEM for the whole sequence (constant index_map);
    # load them once per grid step.
    wh = wh_ref[...]
    wx = wx_ref[...]
    b = b_ref[...]

    def step(k, carry):
        h, c = carry
        x = x_ref[k]                                          # (B, I)
        # Fused pre-activation for all four gates: (B, 4H)
        pre = (
            jnp.dot(h, wh, preferred_element_type=jnp.float32)
            + jnp.dot(x, wx, preferred_element_type=jnp.float32)
            + b
        )
        sig = jax.nn.sigmoid(pre[:, : 3 * H])                 # f | i | o
        c_hat = jnp.tanh(pre[:, 3 * H :])                     # C~
        f = sig[:, :H]
        i = sig[:, H : 2 * H]
        o = sig[:, 2 * H : 3 * H]

        c_new = c * f + c_hat * i
        h_new = jnp.tanh(c_new) * o

        out_ref[k] = h_new                                    # dynamic store on axis 0
        return (h_new, c_new)

    h_fin, c_fin = jax.lax.fori_loop(
        0, t_chunk, step, (h_ref[...], c_ref[...]), unroll=True
    )
    h_ref[...] = h_fin
    c_ref[...] = c_fin


def _pick_t_chunk(seq_len):
    # Largest small divisor of seq_len so the grid covers the sequence exactly.
    for cand in (16, 8, 4, 2, 1):
        if seq_len % cand == 0:
            return cand
    return 1


def lstm_forward(x, fused_params):
    """x: (seq_len, batch, input_size) float32.  Returns (output, hidden, cell)."""
    seq_len, batch, input_size = x.shape
    wh_all = fused_params["wh_all"]   # (H, 4H)
    wx_all = fused_params["wx_all"]   # (I, 4H)
    b_all = fused_params["b_all"]     # (1, 4H)
    hidden_size = wh_all.shape[0]

    # Pad batch to a multiple of 8 (f32 sublane). Padded rows are independent
    # and sliced away below.
    b_pad = max(8, ((batch + 7) // 8) * 8)
    if b_pad != batch:
        x = jnp.pad(x, ((0, 0), (0, b_pad - batch), (0, 0)))

    t_chunk = _pick_t_chunk(seq_len)
    grid = (seq_len // t_chunk,)

    const2d = lambda t: (0, 0)

    grid_spec = pltpu.PrefetchScalarGridSpec(
        num_scalar_prefetch=0,
        grid=grid,
        in_specs=[
            pl.BlockSpec((t_chunk, b_pad, input_size), lambda t: (t, 0, 0)),
            pl.BlockSpec((hidden_size, 4 * hidden_size), const2d),
            pl.BlockSpec((input_size, 4 * hidden_size), const2d),
            pl.BlockSpec((1, 4 * hidden_size), const2d),
        ],
        out_specs=[
            pl.BlockSpec((t_chunk, b_pad, hidden_size), lambda t: (t, 0, 0)),
            pl.BlockSpec((b_pad, hidden_size), const2d),   # h state, VMEM-resident
            pl.BlockSpec((b_pad, hidden_size), const2d),   # c state, VMEM-resident
        ],
    )

    out_shapes = (
        jax.ShapeDtypeStruct((seq_len, b_pad, hidden_size), jnp.float32),
        jax.ShapeDtypeStruct((b_pad, hidden_size), jnp.float32),
        jax.ShapeDtypeStruct((b_pad, hidden_size), jnp.float32),
    )

    kernel = functools.partial(
        _lstm_kernel, t_chunk=t_chunk, hidden_size=hidden_size
    )

    out, h, c = pl.pallas_call(
        kernel,
        out_shape=out_shapes,
        grid_spec=grid_spec,
        compiler_params=pltpu.CompilerParams(
            dimension_semantics=("arbitrary",),  # recurrence => sequential grid
        ),
    )(x, wh_all, wx_all, b_all)

    # Strip batch padding.
    return out[:, :batch], h[:batch], c[:batch]


def init_params(key, input_size, hidden_size):
    """Per-gate params mimicking nn.Linear(input+hidden, hidden) x4 (f,i,o,C)."""
    params = {}
    fan_in = input_size + hidden_size
    bound = 1.0 / jnp.sqrt(fan_in)
    for g in ("f", "i", "o", "c"):
        key, kw, kb = jax.random.split(key, 3)
        # z = [hidden | input], so w[:, :H] hits hidden, w[:, H:] hits input.
        params[f"w{g}"] = jax.random.uniform(
            kw, (hidden_size, fan_in), jnp.float32, -bound, bound
        )
        params[f"b{g}"] = jax.random.uniform(
            kb, (hidden_size,), jnp.float32, -bound, bound
        )
    return params


def fuse_params(params, hidden_size):
    """Hoisted (one-time) transpose + concat of the four gates: order [f|i|o|c]."""
    order = ("f", "i", "o", "c")
    wh_all = jnp.concatenate(
        [params[f"w{g}"][:, :hidden_size].T for g in order], axis=1
    )  # (H, 4H)
    wx_all = jnp.concatenate(
        [params[f"w{g}"][:, hidden_size:].T for g in order], axis=1
    )  # (I, 4H)
    b_all = jnp.concatenate([params[f"b{g}"] for g in order])[None, :]  # (1, 4H)
    # TODO(synk): for large H on v6e/v7x, cast wh_all/wx_all to bf16 (keep f32
    # accumulation) to halve weight VMEM and better feed the 2x256 bf16 MXU.
    return {"wh_all": wh_all, "wx_all": wx_all, "b_all": b_all}


def lstm_reference(x, params):
    """Pure-JAX reference identical to the PyTorch forward."""
    seq_len, batch, _ = x.shape
    hidden_size = params["wf"].shape[0]
    h = jnp.zeros((batch, hidden_size), jnp.float32)
    c = jnp.zeros((batch, hidden_size), jnp.float32)

    def step(carry, xt):
        h, c = carry
        z = jnp.concatenate([h, xt], axis=1)

        def gate(g):
            return z @ params[f"w{g}"].T + params[f"b{g}"]

        f = jax.nn.sigmoid(gate("f"))
        i = jax.nn.sigmoid(gate("i"))
        o = jax.nn.sigmoid(gate("o"))
        c_hat = jnp.tanh(gate("c"))
        c_new = c * f + c_hat * i
        h_new = jnp.tanh(c_new) * o
        return (h_new, c_new), h_new

    (h, c), out = jax.lax.scan(step, (h, c), x)
    return out, h, c


if __name__ == "__main__":
    seq_len, batch, input_size, hidden_size = 8, 2, 16, 32

    key = jax.random.PRNGKey(0)
    key, kx = jax.random.split(key)
    x = jax.random.normal(kx, (seq_len, batch, input_size), jnp.float32)
    params = init_params(key, input_size, hidden_size)
    fused = fuse_params(params, hidden_size)

    out, h, c = lstm_forward(x, fused)
    jax.block_until_ready((out, h, c))

    out_ref, h_ref, c_ref = lstm_reference(x, params)
    assert out.shape == (seq_len, batch, hidden_size)
    assert h.shape == (batch, hidden_size) and c.shape == (batch, hidden_size)
    assert jnp.allclose(out, out_ref, atol=1e-5)
    assert jnp.allclose(h, h_ref, atol=1e-5)
    assert jnp.allclose(c, c_ref, atol=1e-5)

    print("KERNEL_OK")
</pallas_src>

<mosaic_0001>
module attributes {stable_mosaic.version = 11 : i64} {
  func.func @_lstm_kernel(%arg0: i32, %arg1: memref<8x8x16xf32, #tpu.memory_space<vmem>>, %arg2: memref<32x128xf32, #tpu.memory_space<vmem>>, %arg3: memref<16x128xf32, #tpu.memory_space<vmem>>, %arg4: memref<1x128xf32, #tpu.memory_space<vmem>>, %arg5: memref<8x8x32xf32, #tpu.memory_space<vmem>>, %arg6: memref<8x32xf32, #tpu.memory_space<vmem>>, %arg7: memref<8x32xf32, #tpu.memory_space<vmem>>) attributes {dimension_semantics = [#tpu.dimension_semantics<arbitrary>], iteration_bounds = array<i64: 1>, scalar_prefetch = 0 : i64, scratch_operands = 0 : i64, tpu.core_type = #tpu.core_type<tc>, window_params = [{transform_indices = @transform_0, window_bounds = array<i64: 8, 8, 16>}, {pipeline_mode = #tpu.pipeline_mode<synchronous>, transform_indices = @transform_1, window_bounds = array<i64: 32, 128>}, {pipeline_mode = #tpu.pipeline_mode<synchronous>, transform_indices = @transform_2, window_bounds = array<i64: 16, 128>}, {pipeline_mode = #tpu.pipeline_mode<synchronous>, transform_indices = @transform_3, window_bounds = array<i64: 1, 128>}, {transform_indices = @transform_4, window_bounds = array<i64: 8, 8, 32>}, {pipeline_mode = #tpu.pipeline_mode<synchronous>, transform_indices = @transform_5, window_bounds = array<i64: 8, 32>}, {pipeline_mode = #tpu.pipeline_mode<synchronous>, transform_indices = @transform_6, window_bounds = array<i64: 8, 32>}]} {
    %c0_i32 = arith.constant 0 : i32
    %0 = arith.cmpi eq, %arg0, %c0_i32 : i32
    %1 = arith.extui %0 : i1 to i32
    %c0_i32_0 = arith.constant 0 : i32
    %2 = arith.cmpi ne, %1, %c0_i32_0 : i32
    scf.if %2 {
      %cst_70 = arith.constant 0.000000e+00 : f32
      %234 = vector.broadcast %cst_70 : f32 to vector<8x32xf32>
      %c0_71 = arith.constant 0 : index
      %c0_72 = arith.constant 0 : index
      %235 = vector.load %arg6[%c0_71, %c0_72] : memref<8x32xf32, #tpu.memory_space<vmem>>, vector<8x32xf32>
      tpu.vector_store %arg6[%c0_71, %c0_72], %234 {strides = array<i32>} : memref<8x32xf32, #tpu.memory_space<vmem>>, vector<8x32xf32>,
      %cst_73 = arith.constant 0.000000e+00 : f32
      %236 = vector.broadcast %cst_73 : f32 to vector<8x32xf32>
      %c0_74 = arith.constant 0 : index
      %c0_75 = arith.constant 0 : index
      %237 = vector.load %arg7[%c0_74, %c0_75] : memref<8x32xf32, #tpu.memory_space<vmem>>, vector<8x32xf32>
      tpu.vector_store %arg7[%c0_74, %c0_75], %236 {strides = array<i32>} : memref<8x32xf32, #tpu.memory_space<vmem>>, vector<8x32xf32>,
    } else {
    }
    %c0 = arith.constant 0 : index
    %c0_1 = arith.constant 0 : index
    %3 = vector.load %arg2[%c0, %c0_1] : memref<32x128xf32, #tpu.memory_space<vmem>>, vector<32x128xf32>
    %c0_2 = arith.constant 0 : index
    %c0_3 = arith.constant 0 : index
    %4 = vector.load %arg3[%c0_2, %c0_3] : memref<16x128xf32, #tpu.memory_space<vmem>>, vector<16x128xf32>
    %c0_4 = arith.constant 0 : index
    %c0_5 = arith.constant 0 : index
    %5 = vector.load %arg4[%c0_4, %c0_5] : memref<1x128xf32, #tpu.memory_space<vmem>>, vector<1x128xf32>
    %c0_6 = arith.constant 0 : index
    %c0_7 = arith.constant 0 : index
    %6 = vector.load %arg6[%c0_6, %c0_7] : memref<8x32xf32, #tpu.memory_space<vmem>>, vector<8x32xf32>
    %c0_8 = arith.constant 0 : index
    %c0_9 = arith.constant 0 : index
    %7 = vector.load %arg7[%c0_8, %c0_9] : memref<8x32xf32, #tpu.memory_space<vmem>>, vector<8x32xf32>
    %c0_i32_10 = arith.constant 0 : i32
    %8 = arith.index_cast %c0_i32_10 : i32 to index
    %c0_11 = arith.constant 0 : index
    %c0_12 = arith.constant 0 : index
    %9 = vector.load %arg1[%8, %c0_11, %c0_12] : memref<8x8x16xf32, #tpu.memory_space<vmem>>, vector<1x8x16xf32>
    %10 = vector.shape_cast %9 : vector<1x8x16xf32> to vector<8x16xf32>
    %cst = arith.constant dense<0.000000e+00> : vector<8x128xf32>
    %11 = tpu.matmul %6, %3, %cst {dimension_numbers = #tpu.dot_dimension_numbers<[1], [0], [0], [1], [0, 0, 1, 1], [], []>} : vector<8x32xf32>, vector<32x128xf32>, vector<8x128xf32> -> vector<8x128xf32>
    %cst_13 = arith.constant dense<0.000000e+00> : vector<8x128xf32>
    %12 = tpu.matmul %10, %4, %cst_13 {dimension_numbers = #tpu.dot_dimension_numbers<[1], [0], [0], [1], [0, 0, 1, 1], [], []>} : vector<8x16xf32>, vector<16x128xf32>, vector<8x128xf32> -> vector<8x128xf32>
    %13 = arith.addf %11, %12 : vector<8x128xf32>
    %14 = vector.broadcast %5 : vector<1x128xf32> to vector<8x128xf32>
    %15 = arith.addf %13, %14 : vector<8x128xf32>
    %16 = vector.extract_strided_slice %15 {offsets = [0, 0], sizes = [8, 96], strides = [1, 1]} : vector<8x128xf32> to vector<8x96xf32>
    %17 = arith.negf %16 : vector<8x96xf32>
    %18 = math.exp %17 : vector<8x96xf32>
    %cst_14 = arith.constant 1.000000e+00 : f32
    %19 = vector.broadcast %cst_14 : f32 to vector<8x96xf32>
    %20 = arith.addf %19, %18 : vector<8x96xf32>
    %21 = arith.divf %19, %20 : vector<8x96xf32>
    %22 = vector.extract_strided_slice %15 {offsets = [0, 96], sizes = [8, 32], strides = [1, 1]} : vector<8x128xf32> to vector<8x32xf32>
    %23 = math.tanh %22 : vector<8x32xf32>
    %24 = vector.extract_strided_slice %21 {offsets = [0, 0], sizes = [8, 32], strides = [1, 1]} : vector<8x96xf32> to vector<8x32xf32>
    %25 = vector.extract_strided_slice %21 {offsets = [0, 32], sizes = [8, 32], strides = [1, 1]} : vector<8x96xf32> to vector<8x32xf32>
    %26 = vector.extract_strided_slice %21 {offsets = [0, 64], sizes = [8, 32], strides = [1, 1]} : vector<8x96xf32> to vector<8x32xf32>
    %27 = arith.mulf %7, %24 : vector<8x32xf32>
    %28 = arith.mulf %23, %25 : vector<8x32xf32>
    %29 = arith.addf %27, %28 : vector<8x32xf32>
    %30 = math.tanh %29 : vector<8x32xf32>
    %31 = arith.mulf %30, %26 : vector<8x32xf32>
    %32 = arith.index_cast %c0_i32_10 : i32 to index
    %c0_15 = arith.constant 0 : index
    %c0_16 = arith.constant 0 : index
    %33 = vector.load %arg5[%32, %c0_15, %c0_16] : memref<8x8x32xf32, #tpu.memory_space<vmem>>, vector<1x8x32xf32>
    %34 = vector.shape_cast %33 : vector<1x8x32xf32> to vector<8x32xf32>
    %35 = vector.shape_cast %31 : vector<8x32xf32> to vector<1x8x32xf32>
    tpu.vector_store %arg5[%32, %c0_15, %c0_16], %35 {strides = array<i32>} : memref<8x8x32xf32, #tpu.memory_space<vmem>>, vector<1x8x32xf32>,
    %c1_i32 = arith.constant 1 : i32
    %36 = arith.index_cast %c1_i32 : i32 to index
    %c0_17 = arith.constant 0 : index
    %c0_18 = arith.constant 0 : index
    %37 = vector.load %arg1[%36, %c0_17, %c0_18] : memref<8x8x16xf32, #tpu.memory_space<vmem>>, vector<1x8x16xf32>
    %38 = vector.shape_cast %37 : vector<1x8x16xf32> to vector<8x16xf32>
    %cst_19 = arith.constant dense<0.000000e+00> : vector<8x128xf32>
    %39 = tpu.matmul %31, %3, %cst_19 {dimension_numbers = #tpu.dot_dimension_numbers<[1], [0], [0], [1], [0, 0, 1, 1], [], []>} : vector<8x32xf32>, vector<32x128xf32>, vector<8x128xf32> -> vector<8x128xf32>
    %cst_20 = arith.constant dense<0.000000e+00> : vector<8x128xf32>
    %40 = tpu.matmul %38, %4, %cst_20 {dimension_numbers = #tpu.dot_dimension_numbers<[1], [0], [0], [1], [0, 0, 1, 1], [], []>} : vector<8x16xf32>, vector<16x128xf32>, vector<8x128xf32> -> vector<8x128xf32>
    %41 = arith.addf %39, %40 : vector<8x128xf32>
    %42 = vector.broadcast %5 : vector<1x128xf32> to vector<8x128xf32>
    %43 = arith.addf %41, %42 : vector<8x128xf32>
    %44 = vector.extract_strided_slice %43 {offsets = [0, 0], sizes = [8, 96], strides = [1, 1]} : vector<8x128xf32> to vector<8x96xf32>
    %45 = arith.negf %44 : vector<8x96xf32>
    %46 = math.exp %45 : vector<8x96xf32>
    %cst_21 = arith.constant 1.000000e+00 : f32
    %47 = vector.broadcast %cst_21 : f32 to vector<8x96xf32>
    %48 = arith.addf %47, %46 : vector<8x96xf32>
    %49 = arith.divf %47, %48 : vector<8x96xf32>
    %50 = vector.extract_strided_slice %43 {offsets = [0, 96], sizes = [8, 32], strides = [1, 1]} : vector<8x128xf32> to vector<8x32xf32>
    %51 = math.tanh %50 : vector<8x32xf32>
    %52 = vector.extract_strided_slice %49 {offsets = [0, 0], sizes = [8, 32], strides = [1, 1]} : vector<8x96xf32> to vector<8x32xf32>
    %53 = vector.extract_strided_slice %49 {offsets = [0, 32], sizes = [8, 32], strides = [1, 1]} : vector<8x96xf32> to vector<8x32xf32>
    %54 = vector.extract_strided_slice %49 {offsets = [0, 64], sizes = [8, 32], strides = [1, 1]} : vector<8x96xf32> to vector<8x32xf32>
    %55 = arith.mulf %29, %52 : vector<8x32xf32>
    %56 = arith.mulf %51, %53 : vector<8x32xf32>
    %57 = arith.addf %55, %56 : vector<8x32xf32>
    %58 = math.tanh %57 : vector<8x32xf32>
    %59 = arith.mulf %58, %54 : vector<8x32xf32>
    %60 = arith.index_cast %c1_i32 : i32 to index
    %c0_22 = arith.constant 0 : index
    %c0_23 = arith.constant 0 : index
    %61 = vector.load %arg5[%60, %c0_22, %c0_23] : memref<8x8x32xf32, #tpu.memory_space<vmem>>, vector<1x8x32xf32>
    %62 = vector.shape_cast %61 : vector<1x8x32xf32> to vector<8x32xf32>
    %63 = vector.shape_cast %59 : vector<8x32xf32> to vector<1x8x32xf32>
    tpu.vector_store %arg5[%60, %c0_22, %c0_23], %63 {strides = array<i32>} : memref<8x8x32xf32, #tpu.memory_space<vmem>>, vector<1x8x32xf32>,
    %c2_i32 = arith.constant 2 : i32
    %64 = arith.index_cast %c2_i32 : i32 to index
    %c0_24 = arith.constant 0 : index
    %c0_25 = arith.constant 0 : index
    %65 = vector.load %arg1[%64, %c0_24, %c0_25] : memref<8x8x16xf32, #tpu.memory_space<vmem>>, vector<1x8x16xf32>
    %66 = vector.shape_cast %65 : vector<1x8x16xf32> to vector<8x16xf32>
    %cst_26 = arith.constant dense<0.000000e+00> : vector<8x128xf32>
    %67 = tpu.matmul %59, %3, %cst_26 {dimension_numbers = #tpu.dot_dimension_numbers<[1], [0], [0], [1], [0, 0, 1, 1], [], []>} : vector<8x32xf32>, vector<32x128xf32>, vector<8x128xf32> -> vector<8x128xf32>
    %cst_27 = arith.constant dense<0.000000e+00> : vector<8x128xf32>
    %68 = tpu.matmul %66, %4, %cst_27 {dimension_numbers = #tpu.dot_dimension_numbers<[1], [0], [0], [1], [0, 0, 1, 1], [], []>} : vector<8x16xf32>, vector<16x128xf32>, vector<8x128xf32> -> vector<8x128xf32>
    %69 = arith.addf %67, %68 : vector<8x128xf32>
    %70 = vector.broadcast %5 : vector<1x128xf32> to vector<8x128xf32>
    %71 = arith.addf %69, %70 : vector<8x128xf32>
    %72 = vector.extract_strided_slice %71 {offsets = [0, 0], sizes = [8, 96], strides = [1, 1]} : vector<8x128xf32> to vector<8x96xf32>
    %73 = arith.negf %72 : vector<8x96xf32>
    %74 = math.exp %73 : vector<8x96xf32>
    %cst_28 = arith.constant 1.000000e+00 : f32
    %75 = vector.broadcast %cst_28 : f32 to vector<8x96xf32>
    %76 = arith.addf %75, %74 : vector<8x96xf32>
    %77 = arith.divf %75, %76 : vector<8x96xf32>
    %78 = vector.extract_strided_slice %71 {offsets = [0, 96], sizes = [8, 32], strides = [1, 1]} : vector<8x128xf32> to vector<8x32xf32>
    %79 = math.tanh %78 : vector<8x32xf32>
    %80 = vector.extract_strided_slice %77 {offsets = [0, 0], sizes = [8, 32], strides = [1, 1]} : vector<8x96xf32> to vector<8x32xf32>
    %81 = vector.extract_strided_slice %77 {offsets = [0, 32], sizes = [8, 32], strides = [1, 1]} : vector<8x96xf32> to vector<8x32xf32>
    %82 = vector.extract_strided_slice %77 {offsets = [0, 64], sizes = [8, 32], strides = [1, 1]} : vector<8x96xf32> to vector<8x32xf32>
    %83 = arith.mulf %57, %80 : vector<8x32xf32>
    %84 = arith.mulf %79, %81 : vector<8x32xf32>
    %85 = arith.addf %83, %84 : vector<8x32xf32>
    %86 = math.tanh %85 : vector<8x32xf32>
    %87 = arith.mulf %86, %82 : vector<8x32xf32>
    %88 = arith.index_cast %c2_i32 : i32 to index
    %c0_29 = arith.constant 0 : index
    %c0_30 = arith.constant 0 : index
    %89 = vector.load %arg5[%88, %c0_29, %c0_30] : memref<8x8x32xf32, #tpu.memory_space<vmem>>, vector<1x8x32xf32>
    %90 = vector.shape_cast %89 : vector<1x8x32xf32> to vector<8x32xf32>
    %91 = vector.shape_cast %87 : vector<8x32xf32> to vector<1x8x32xf32>
    tpu.vector_store %arg5[%88, %c0_29, %c0_30], %91 {strides = array<i32>} : memref<8x8x32xf32, #tpu.memory_space<vmem>>, vector<1x8x32xf32>,
    %c3_i32 = arith.constant 3 : i32
    %92 = arith.index_cast %c3_i32 : i32 to index
    %c0_31 = arith.constant 0 : index
    %c0_32 = arith.constant 0 : index
    %93 = vector.load %arg1[%92, %c0_31, %c0_32] : memref<8x8x16xf32, #tpu.memory_space<vmem>>, vector<1x8x16xf32>
    %94 = vector.shape_cast %93 : vector<1x8x16xf32> to vector<8x16xf32>
    %cst_33 = arith.constant dense<0.000000e+00> : vector<8x128xf32>
    %95 = tpu.matmul %87, %3, %cst_33 {dimension_numbers = #tpu.dot_dimension_numbers<[1], [0], [0], [1], [0, 0, 1, 1], [], []>} : vector<8x32xf32>, vector<32x128xf32>, vector<8x128xf32> -> vector<8x128xf32>
    %cst_34 = arith.constant dense<0.000000e+00> : vector<8x128xf32>
    %96 = tpu.matmul %94, %4, %cst_34 {dimension_numbers = #tpu.dot_dimension_numbers<[1], [0], [0], [1], [0, 0, 1, 1], [], []>} : vector<8x16xf32>, vector<16x128xf32>, vector<8x128xf32> -> vector<8x128xf32>
    %97 = arith.addf %95, %96 : vector<8x128xf32>
    %98 = vector.broadcast %5 : vector<1x128xf32> to vector<8x128xf32>
    %99 = arith.addf %97, %98 : vector<8x128xf32>
    %100 = vector.extract_strided_slice %99 {offsets = [0, 0], sizes = [8, 96], strides = [1, 1]} : vector<8x128xf32> to vector<8x96xf32>
    %101 = arith.negf %100 : vector<8x96xf32>
    %102 = math.exp %101 : vector<8x96xf32>
    %cst_35 = arith.constant 1.000000e+00 : f32
    %103 = vector.broadcast %cst_35 : f32 to vector<8x96xf32>
    %104 = arith.addf %103, %102 : vector<8x96xf32>
    %105 = arith.divf %103, %104 : vector<8x96xf32>
    %106 = vector.extract_strided_slice %99 {offsets = [0, 96], sizes = [8, 32], strides = [1, 1]} : vector<8x128xf32> to vector<8x32xf32>
    %107 = math.tanh %106 : vector<8x32xf32>
    %108 = vector.extract_strided_slice %105 {offsets = [0, 0], sizes = [8, 32], strides = [1, 1]} : vector<8x96xf32> to vector<8x32xf32>
    %109 = vector.extract_strided_slice %105 {offsets = [0, 32], sizes = [8, 32], strides = [1, 1]} : vector<8x96xf32> to vector<8x32xf32>
    %110 = vector.extract_strided_slice %105 {offsets = [0, 64], sizes = [8, 32], strides = [1, 1]} : vector<8x96xf32> to vector<8x32xf32>
    %111 = arith.mulf %85, %108 : vector<8x32xf32>
    %112 = arith.mulf %107, %109 : vector<8x32xf32>
    %113 = arith.addf %111, %112 : vector<8x32xf32>
    %114 = math.tanh %113 : vector<8x32xf32>
    %115 = arith.mulf %114, %110 : vector<8x32xf32>
    %116 = arith.index_cast %c3_i32 : i32 to index
    %c0_36 = arith.constant 0 : index
    %c0_37 = arith.constant 0 : index
    %117 = vector.load %arg5[%116, %c0_36, %c0_37] : memref<8x8x32xf32, #tpu.memory_space<vmem>>, vector<1x8x32xf32>
    %118 = vector.shape_cast %117 : vector<1x8x32xf32> to vector<8x32xf32>
    %119 = vector.shape_cast %115 : vector<8x32xf32> to vector<1x8x32xf32>
    tpu.vector_store %arg5[%116, %c0_36, %c0_37], %119 {strides = array<i32>} : memref<8x8x32xf32, #tpu.memory_space<vmem>>, vector<1x8x32xf32>,
    %c4_i32 = arith.constant 4 : i32
    %120 = arith.index_cast %c4_i32 : i32 to index
    %c0_38 = arith.constant 0 : index
    %c0_39 = arith.constant 0 : index
    %121 = vector.load %arg1[%120, %c0_38, %c0_39] : memref<8x8x16xf32, #tpu.memory_space<vmem>>, vector<1x8x16xf32>
    %122 = vector.shape_cast %121 : vector<1x8x16xf32> to vector<8x16xf32>
    %cst_40 = arith.constant dense<0.000000e+00> : vector<8x128xf32>
    %123 = tpu.matmul %115, %3, %cst_40 {dimension_numbers = #tpu.dot_dimension_numbers<[1], [0], [0], [1], [0, 0, 1, 1], [], []>} : vector<8x32xf32>, vector<32x128xf32>, vector<8x128xf32> -> vector<8x128xf32>
    %cst_41 = arith.constant dense<0.000000e+00> : vector<8x128xf32>
    %124 = tpu.matmul %122, %4, %cst_41 {dimension_numbers = #tpu.dot_dimension_numbers<[1], [0], [0], [1], [0, 0, 1, 1], [], []>} : vector<8x16xf32>, vector<16x128xf32>, vector<8x128xf32> -> vector<8x128xf32>
    %125 = arith.addf %123, %124 : vector<8x128xf32>
    %126 = vector.broadcast %5 : vector<1x128xf32> to vector<8x128xf32>
    %127 = arith.addf %125, %126 : vector<8x128xf32>
    %128 = vector.extract_strided_slice %127 {offsets = [0, 0], sizes = [8, 96], strides = [1, 1]} : vector<8x128xf32> to vector<8x96xf32>
    %129 = arith.negf %128 : vector<8x96xf32>
    %130 = math.exp %129 : vector<8x96xf32>
    %cst_42 = arith.constant 1.000000e+00 : f32
    %131 = vector.broadcast %cst_42 : f32 to vector<8x96xf32>
    %132 = arith.addf %131, %130 : vector<8x96xf32>
    %133 = arith.divf %131, %132 : vector<8x96xf32>
    %134 = vector.extract_strided_slice %127 {offsets = [0, 96], sizes = [8, 32], strides = [1, 1]} : vector<8x128xf32> to vector<8x32xf32>
    %135 = math.tanh %134 : vector<8x32xf32>
    %136 = vector.extract_strided_slice %133 {offsets = [0, 0], sizes = [8, 32], strides = [1, 1]} : vector<8x96xf32> to vector<8x32xf32>
    %137 = vector.extract_strided_slice %133 {offsets = [0, 32], sizes = [8, 32], strides = [1, 1]} : vector<8x96xf32> to vector<8x32xf32>
    %138 = vector.extract_strided_slice %133 {offsets = [0, 64], sizes = [8, 32], strides = [1, 1]} : vector<8x96xf32> to vector<8x32xf32>
    %139 = arith.mulf %113, %136 : vector<8x32xf32>
    %140 = arith.mulf %135, %137 : vector<8x32xf32>
    %141 = arith.addf %139, %140 : vector<8x32xf32>
    %142 = math.tanh %141 : vector<8x32xf32>
    %143 = arith.mulf %142, %138 : vector<8x32xf32>
    %144 = arith.index_cast %c4_i32 : i32 to index
    %c0_43 = arith.constant 0 : index
    %c0_44 = arith.constant 0 : index
    %145 = vector.load %arg5[%144, %c0_43, %c0_44] : memref<8x8x32xf32, #tpu.memory_space<vmem>>, vector<1x8x32xf32>
    %146 = vector.shape_cast %145 : vector<1x8x32xf32> to vector<8x32xf32>
    %147 = vector.shape_cast %143 : vector<8x32xf32> to vector<1x8x32xf32>
    tpu.vector_store %arg5[%144, %c0_43, %c0_44], %147 {strides = array<i32>} : memref<8x8x32xf32, #tpu.memory_space<vmem>>, vector<1x8x32xf32>,
    %c5_i32 = arith.constant 5 : i32
    %148 = arith.index_cast %c5_i32 : i32 to index
    %c0_45 = arith.constant 0 : index
    %c0_46 = arith.constant 0 : index
    %149 = vector.load %arg1[%148, %c0_45, %c0_46] : memref<8x8x16xf32, #tpu.memory_space<vmem>>, vector<1x8x16xf32>
    %150 = vector.shape_cast %149 : vector<1x8x16xf32> to vector<8x16xf32>
    %cst_47 = arith.constant dense<0.000000e+00> : vector<8x128xf32>
    %151 = tpu.matmul %143, %3, %cst_47 {dimension_numbers = #tpu.dot_dimension_numbers<[1], [0], [0], [1], [0, 0, 1, 1], [], []>} : vector<8x32xf32>, vector<32x128xf32>, vector<8x128xf32> -> vector<8x128xf32>
    %cst_48 = arith.constant dense<0.000000e+00> : vector<8x128xf32>
    %152 = tpu.matmul %150, %4, %cst_48 {dimension_numbers = #tpu.dot_dimension_numbers<[1], [0], [0], [1], [0, 0, 1, 1], [], []>} : vector<8x16xf32>, vector<16x128xf32>, vector<8x128xf32> -> vector<8x128xf32>
    %153 = arith.addf %151, %152 : vector<8x128xf32>
    %154 = vector.broadcast %5 : vector<1x128xf32> to vector<8x128xf32>
    %155 = arith.addf %153, %154 : vector<8x128xf32>
    %156 = vector.extract_strided_slice %155 {offsets = [0, 0], sizes = [8, 96], strides = [1, 1]} : vector<8x128xf32> to vector<8x96xf32>
    %157 = arith.negf %156 : vector<8x96xf32>
    %158 = math.exp %157 : vector<8x96xf32>
    %cst_49 = arith.constant 1.000000e+00 : f32
    %159 = vector.broadcast %cst_49 : f32 to vector<8x96xf32>
    %160 = arith.addf %159, %158 : vector<8x96xf32>
    %161 = arith.divf %159, %160 : vector<8x96xf32>
    %162 = vector.extract_strided_slice %155 {offsets = [0, 96], sizes = [8, 32], strides = [1, 1]} : vector<8x128xf32> to vector<8x32xf32>
    %163 = math.tanh %162 : vector<8x32xf32>
    %164 = vector.extract_strided_slice %161 {offsets = [0, 0], sizes = [8, 32], strides = [1, 1]} : vector<8x96xf32> to vector<8x32xf32>
    %165 = vector.extract_strided_slice %161 {offsets = [0, 32], sizes = [8, 32], strides = [1, 1]} : vector<8x96xf32> to vector<8x32xf32>
    %166 = vector.extract_strided_slice %161 {offsets = [0, 64], sizes = [8, 32], strides = [1, 1]} : vector<8x96xf32> to vector<8x32xf32>
    %167 = arith.mulf %141, %164 : vector<8x32xf32>
    %168 = arith.mulf %163, %165 : vector<8x32xf32>
    %169 = arith.addf %167, %168 : vector<8x32xf32>
    %170 = math.tanh %169 : vector<8x32xf32>
    %171 = arith.mulf %170, %166 : vector<8x32xf32>
    %172 = arith.index_cast %c5_i32 : i32 to index
    %c0_50 = arith.constant 0 : index
    %c0_51 = arith.constant 0 : index
    %173 = vector.load %arg5[%172, %c0_50, %c0_51] : memref<8x8x32xf32, #tpu.memory_space<vmem>>, vector<1x8x32xf32>
    %174 = vector.shape_cast %173 : vector<1x8x32xf32> to vector<8x32xf32>
    %175 = vector.shape_cast %171 : vector<8x32xf32> to vector<1x8x32xf32>
    tpu.vector_store %arg5[%172, %c0_50, %c0_51], %175 {strides = array<i32>} : memref<8x8x32xf32, #tpu.memory_space<vmem>>, vector<1x8x32xf32>,
    %c6_i32 = arith.constant 6 : i32
    %176 = arith.index_cast %c6_i32 : i32 to index
    %c0_52 = arith.constant 0 : index
    %c0_53 = arith.constant 0 : index
    %177 = vector.load %arg1[%176, %c0_52, %c0_53] : memref<8x8x16xf32, #tpu.memory_space<vmem>>, vector<1x8x16xf32>
    %178 = vector.shape_cast %177 : vector<1x8x16xf32> to vector<8x16xf32>
    %cst_54 = arith.constant dense<0.000000e+00> : vector<8x128xf32>
    %179 = tpu.matmul %171, %3, %cst_54 {dimension_numbers = #tpu.dot_dimension_numbers<[1], [0], [0], [1], [0, 0, 1, 1], [], []>} : vector<8x32xf32>, vector<32x128xf32>, vector<8x128xf32> -> vector<8x128xf32>
    %cst_55 = arith.constant dense<0.000000e+00> : vector<8x128xf32>
    %180 = tpu.matmul %178, %4, %cst_55 {dimension_numbers = #tpu.dot_dimension_numbers<[1], [0], [0], [1], [0, 0, 1, 1], [], []>} : vector<8x16xf32>, vector<16x128xf32>, vector<8x128xf32> -> vector<8x128xf32>
    %181 = arith.addf %179, %180 : vector<8x128xf32>
    %182 = vector.broadcast %5 : vector<1x128xf32> to vector<8x128xf32>
    %183 = arith.addf %181, %182 : vector<8x128xf32>
    %184 = vector.extract_strided_slice %183 {offsets = [0, 0], sizes = [8, 96], strides = [1, 1]} : vector<8x128xf32> to vector<8x96xf32>
    %185 = arith.negf %184 : vector<8x96xf32>
    %186 = math.exp %185 : vector<8x96xf32>
    %cst_56 = arith.constant 1.000000e+00 : f32
    %187 = vector.broadcast %cst_56 : f32 to vector<8x96xf32>
    %188 = arith.addf %187, %186 : vector<8x96xf32>
    %189 = arith.divf %187, %188 : vector<8x96xf32>
    %190 = vector.extract_strided_slice %183 {offsets = [0, 96], sizes = [8, 32], strides = [1, 1]} : vector<8x128xf32> to vector<8x32xf32>
    %191 = math.tanh %190 : vector<8x32xf32>
    %192 = vector.extract_strided_slice %189 {offsets = [0, 0], sizes = [8, 32], strides = [1, 1]} : vector<8x96xf32> to vector<8x32xf32>
    %193 = vector.extract_strided_slice %189 {offsets = [0, 32], sizes = [8, 32], strides = [1, 1]} : vector<8x96xf32> to vector<8x32xf32>
    %194 = vector.extract_strided_slice %189 {offsets = [0, 64], sizes = [8, 32], strides = [1, 1]} : vector<8x96xf32> to vector<8x32xf32>
    %195 = arith.mulf %169, %192 : vector<8x32xf32>
    %196 = arith.mulf %191, %193 : vector<8x32xf32>
    %197 = arith.addf %195, %196 : vector<8x32xf32>
    %198 = math.tanh %197 : vector<8x32xf32>
    %199 = arith.mulf %198, %194 : vector<8x32xf32>
    %200 = arith.index_cast %c6_i32 : i32 to index
    %c0_57 = arith.constant 0 : index
    %c0_58 = arith.constant 0 : index
    %201 = vector.load %arg5[%200, %c0_57, %c0_58] : memref<8x8x32xf32, #tpu.memory_space<vmem>>, vector<1x8x32xf32>
    %202 = vector.shape_cast %201 : vector<1x8x32xf32> to vector<8x32xf32>
    %203 = vector.shape_cast %199 : vector<8x32xf32> to vector<1x8x32xf32>
    tpu.vector_store %arg5[%200, %c0_57, %c0_58], %203 {strides = array<i32>} : memref<8x8x32xf32, #tpu.memory_space<vmem>>, vector<1x8x32xf32>,
    %c7_i32 = arith.constant 7 : i32
    %204 = arith.index_cast %c7_i32 : i32 to index
    %c0_59 = arith.constant 0 : index
    %c0_60 = arith.constant 0 : index
    %205 = vector.load %arg1[%204, %c0_59, %c0_60] : memref<8x8x16xf32, #tpu.memory_space<vmem>>, vector<1x8x16xf32>
    %206 = vector.shape_cast %205 : vector<1x8x16xf32> to vector<8x16xf32>
    %cst_61 = arith.constant dense<0.000000e+00> : vector<8x128xf32>
    %207 = tpu.matmul %199, %3, %cst_61 {dimension_numbers = #tpu.dot_dimension_numbers<[1], [0], [0], [1], [0, 0, 1, 1], [], []>} : vector<8x32xf32>, vector<32x128xf32>, vector<8x128xf32> -> vector<8x128xf32>
    %cst_62 = arith.constant dense<0.000000e+00> : vector<8x128xf32>
    %208 = tpu.matmul %206, %4, %cst_62 {dimension_numbers = #tpu.dot_dimension_numbers<[1], [0], [0], [1], [0, 0, 1, 1], [], []>} : vector<8x16xf32>, vector<16x128xf32>, vector<8x128xf32> -> vector<8x128xf32>
    %209 = arith.addf %207, %208 : vector<8x128xf32>
    %210 = vector.broadcast %5 : vector<1x128xf32> to vector<8x128xf32>
    %211 = arith.addf %209, %210 : vector<8x128xf32>
    %212 = vector.extract_strided_slice %211 {offsets = [0, 0], sizes = [8, 96], strides = [1, 1]} : vector<8x128xf32> to vector<8x96xf32>
    %213 = arith.negf %212 : vector<8x96xf32>
    %214 = math.exp %213 : vector<8x96xf32>
    %cst_63 = arith.constant 1.000000e+00 : f32
    %215 = vector.broadcast %cst_63 : f32 to vector<8x96xf32>
    %216 = arith.addf %215, %214 : vector<8x96xf32>
    %217 = arith.divf %215, %216 : vector<8x96xf32>
    %218 = vector.extract_strided_slice %211 {offsets = [0, 96], sizes = [8, 32], strides = [1, 1]} : vector<8x128xf32> to vector<8x32xf32>
    %219 = math.tanh %218 : vector<8x32xf32>
    %220 = vector.extract_strided_slice %217 {offsets = [0, 0], sizes = [8, 32], strides = [1, 1]} : vector<8x96xf32> to vector<8x32xf32>
    %221 = vector.extract_strided_slice %217 {offsets = [0, 32], sizes = [8, 32], strides = [1, 1]} : vector<8x96xf32> to vector<8x32xf32>
    %222 = vector.extract_strided_slice %217 {offsets = [0, 64], sizes = [8, 32], strides = [1, 1]} : vector<8x96xf32> to vector<8x32xf32>
    %223 = arith.mulf %197, %220 : vector<8x32xf32>
    %224 = arith.mulf %219, %221 : vector<8x32xf32>
    %225 = arith.addf %223, %224 : vector<8x32xf32>
    %226 = math.tanh %225 : vector<8x32xf32>
    %227 = arith.mulf %226, %222 : vector<8x32xf32>
    %228 = arith.index_cast %c7_i32 : i32 to index
    %c0_64 = arith.constant 0 : index
    %c0_65 = arith.constant 0 : index
    %229 = vector.load %arg5[%228, %c0_64, %c0_65] : memref<8x8x32xf32, #tpu.memory_space<vmem>>, vector<1x8x32xf32>
    %230 = vector.shape_cast %229 : vector<1x8x32xf32> to vector<8x32xf32>
    %231 = vector.shape_cast %227 : vector<8x32xf32> to vector<1x8x32xf32>
    tpu.vector_store %arg5[%228, %c0_64, %c0_65], %231 {strides = array<i32>} : memref<8x8x32xf32, #tpu.memory_space<vmem>>, vector<1x8x32xf32>,
    %c8_i32 = arith.constant 8 : i32
    %c0_66 = arith.constant 0 : index
    %c0_67 = arith.constant 0 : index
    %232 = vector.load %arg6[%c0_66, %c0_67] : memref<8x32xf32, #tpu.memory_space<vmem>>, vector<8x32xf32>
    tpu.vector_store %arg6[%c0_66, %c0_67], %227 {strides = array<i32>} : memref<8x32xf32, #tpu.memory_space<vmem>>, vector<8x32xf32>,
    %c0_68 = arith.constant 0 : index
    %c0_69 = arith.constant 0 : index
    %233 = vector.load %arg7[%c0_68, %c0_69] : memref<8x32xf32, #tpu.memory_space<vmem>>, vector<8x32xf32>
    tpu.vector_store %arg7[%c0_68, %c0_69], %225 {strides = array<i32>} : memref<8x32xf32, #tpu.memory_space<vmem>>, vector<8x32xf32>,
    return
  }
  func.func @transform_0(%arg0: i32) -> (i32, i32, i32) {
    %c0_i32 = arith.constant 0 : i32
    %c0_i32_0 = arith.constant 0 : i32
    %c0_i32_1 = arith.constant 0 : i32
    return %arg0, %c0_i32, %c0_i32_0 : i32, i32, i32
  }
  func.func @transform_1(%arg0: i32) -> (i32, i32) {
    %c0_i32 = arith.constant 0 : i32
    %c0_i32_0 = arith.constant 0 : i32
    %c0_i32_1 = arith.constant 0 : i32
    return %c0_i32, %c0_i32_0 : i32, i32
  }
  func.func @transform_2(%arg0: i32) -> (i32, i32) {
    %c0_i32 = arith.constant 0 : i32
    %c0_i32_0 = arith.constant 0 : i32
    %c0_i32_1 = arith.constant 0 : i32
    return %c0_i32, %c0_i32_0 : i32, i32
  }
  func.func @transform_3(%arg0: i32) -> (i32, i32) {
    %c0_i32 = arith.constant 0 : i32
    %c0_i32_0 = arith.constant 0 : i32
    %c0_i32_1 = arith.constant 0 : i32
    return %c0_i32, %c0_i32_0 : i32, i32
  }
  func.func @transform_4(%arg0: i32) -> (i32, i32, i32) {
    %c0_i32 = arith.constant 0 : i32
    %c0_i32_0 = arith.constant 0 : i32
    %c0_i32_1 = arith.constant 0 : i32
    return %arg0, %c0_i32, %c0_i32_0 : i32, i32, i32
  }
  func.func @transform_5(%arg0: i32) -> (i32, i32) {
    %c0_i32 = arith.constant 0 : i32
    %c0_i32_0 = arith.constant 0 : i32
    %c0_i32_1 = arith.constant 0 : i32
    return %c0_i32, %c0_i32_0 : i32, i32
  }
  func.func @transform_6(%arg0: i32) -> (i32, i32) {
    %c0_i32 = arith.constant 0 : i32
    %c0_i32_0 = arith.constant 0 : i32
    %c0_i32_1 = arith.constant 0 : i32
    return %c0_i32, %c0_i32_0 : i32, i32
  }
}

</mosaic_0001>

<bundles_post_ra>
// kernel: tpu_custom_call.1
= control target key start
LH: loop header
LB: loop body
LE: loop exit
PB: predicated region body
PF: predicated region fallthrough
CT: control target
= control target key end

     0   :  { %12 = vsyncpa [#allocation3], 0  ;;  %s1258_s0 = inlined_call_operand.hbm [shape: f32[8,8,16], index: 0, kind: input, shape index: {}]   ;;  %s1259_s1 = inlined_call_operand.hbm [shape: f32[32,128], index: 1, kind: input, shape index: {}]   ;;  %s1260_s2 = inlined_call_operand.hbm [shape: f32[16,128], index: 2, kind: input, shape index: {}]   ;;  %s1261_s3 = inlined_call_operand.vmem [shape: f32[1,128], index: 3, kind: input, shape index: {}]   ;;  %s1262_s4 = inlined_call_operand.hbm [shape: f32[8,8,32], index: 4, kind: output, shape index: {0}]   ;;  %s1263_s5 = inlined_call_operand.hbm [shape: f32[8,32], index: 5, kind: output, shape index: {1}]   ;;  %s1264_s6 = inlined_call_operand.hbm [shape: f32[8,32], index: 6, kind: output, shape index: {2}]  }
   0x1   :  { %13 = vsyncpa [#allocation6], 0 }
   0x2   :  { %14 = vsyncpa [#allocation4], 0 }
   0x3   :  { %15 = vsyncpa [#allocation10], 0  ;;  %s33_s23 = sshll.u32 %s1259_s1, 4  ;;  %s1065_s24 = smov [#allocation5]   ;;  %s34_s23 = int_to_ptr.hbm [resolvable:$true] %s33_s23 }
   0x4   :  { %s35_s25 = sshll.u32 %s1065_s24, 4  ;;  %s20_s28 = sshll.u32 %s1258_s0, 4  ;;  %s36_s25 = int_to_ptr.vmem [resolvable:$true] %s35_s25  ;;  %s21_s28 = int_to_ptr.hbm [resolvable:$true] %s20_s28 }
   0x5   :  { %s1066_s29 = smov 128   ;;  %s1067_s30 = smov 8  }
   0x6   :  { %41 = dma.hbm_to_vmem [thread:$0]  %s34_s23, 512, %s36_s25, [#allocation6], %s1066_s29, %s1066_s29, %s1067_s30  }
   0x7   :  { %s1068_s7 = smov [#allocation2]   ;;  %s46_s1 = sshll.u32 %s1260_s2, 4  ;;  %s47_s1 = int_to_ptr.hbm [resolvable:$true] %s46_s1 }
   0x8   :  { %s22_s8 = sshll.u32 %s1068_s7, 4  ;;  %s1069_s0 = smov [#allocation7]   ;;  %s23_s8 = int_to_ptr.vmem [resolvable:$true] %s22_s8 }
   0x9   :  { %28 = dma.hbm_to_vmem [thread:$0]  %s21_s28, 1024, %s23_s8, [#allocation3], %s1066_s29, %s1066_s29, %s1067_s30  }
   0xa   :  { %s48_s11 = sshll.u32 %s1069_s0, 4  ;;  %s49_s11 = int_to_ptr.vmem [resolvable:$true] %s48_s11 }
   0xb   :  { %54 = dma.hbm_to_vmem [thread:$0]  %s47_s1, 256, %s49_s11, [#allocation6], %s1066_s29, %s1066_s29, %s1067_s30  }
   0xc   :  { %1057 = dma.done.wait [#allocation3], 1024  }
   0xd   :  { %1058 = vsyncadd [#allocation3], 4294966272 }
   0xe   :  { %1059 = dma.done.wait [#allocation6], 768  }
   0xf   :  { %1060 = vsyncadd [#allocation6], 4294966528  ;;  %vm73_vm0 = vcmask 261120   ;;  %v1070_v0 = vmov 0.0   ;;  %v1131_v1 = vld [vmem:[#allocation5 + $0x18] sm:$0xff]  ;;  %v1133_v2 = vld [vmem:[#allocation5 + $0x10] sm:$0xff] }
  0x10   :  { %74 = vst.msk [vmem:[#allocation9] sm:$0xff] %vm73_vm0, %v1070_v0  ;;  %v1135_v3 = vld [vmem:[#allocation7 + $0x8] sm:$0xff]  ;;  %126 = vmatpush.msra.mxu1 %v1131_v1  ;;  %v1139_v4 = vld [vmem:[#allocation7] sm:$0xff]  ;;  %vm86_vm1 = vcmask 130048   ;;  %212 = vmatpush.msra.mxu3 %v1131_v1  ;;  %s1072_s13 = smov 32   ;;  %v257_v57 = vld [vmem:[#allocation2 + $0x10] sm:$0xff] }
  0x11   :  { %75 = vst.msk [vmem:[#allocation11] sm:$0xff] %vm73_vm0, %v1070_v0  ;;  %104 = vmatpush.msra.mxu0 %v1135_v3  ;;  %v1141_v5 = vld [vmem:[#allocation5 + $0x8] sm:$0xff]  ;;  %v85_v6 = vld [vmem:[#allocation2] sm:$0xff]  ;;  %191 = vmatpush.msra.mxu2 %v1135_v3  ;;  %s1073_s14 = smov [#allocation8]   ;;  %s768_s18 = sshll.u32 %s1262_s4, 4  ;;  %s769_s18 = int_to_ptr.hbm [resolvable:$true] %s768_s18 }
  0x12   :  { %127 = vmatpush.msra.mxu1 %v1133_v2  ;;  %v1147_v7 = vld [vmem:[#allocation5] sm:$0xff]  ;;  %213 = vmatpush.msra.mxu3 %v1133_v2  ;;  %v173_v30 = vld [vmem:[#allocation2 + $0x8] sm:$0xff]  ;;  %s766_s15 = sshll.u32 %s1073_s14, 4  ;;  %s1074_s19 = smov [#allocation9]   ;;  %s767_s15 = int_to_ptr.vmem [resolvable:$true] %s766_s15 }
  0x13   :  { %105 = vmatpush.msra.mxu0 %v1139_v4  ;;  %192 = vmatpush.msra.mxu2 %v1139_v4  ;;  %v1176_v10 = vld [vmem:[%s1261_s3] ss:$0 sm:$0xff]  ;;  %s1071_s3 = smov 64   ;;  %s780_s20 = sshll.u32 %s1074_s19, 4  ;;  %s781_s20 = int_to_ptr.vmem [resolvable:$true] %s780_s20 }
  0x14   :  { %813 = vmatmul.msk.f32.vlgmr.msra.gmra.mxu0 %vm86_vm1, %v85_v6  ;;  %128 = vmatpush.msra.mxu1 %v1141_v5  ;;  %s782_s23 = sshll.u32 %s1263_s5, 4  ;;  %s1075_s24 = smov [#allocation11]   ;;  %s783_s23 = int_to_ptr.hbm [resolvable:$true] %s782_s23 }
  0x15   :  { %214 = vmatpush.msra.mxu3 %v1141_v5  ;;  %296 = vmatpush.msrb.mxu2 %v1131_v1  ;;  %s791_s25 = sshll.u32 %s1075_s24, 4  ;;  %s793_s28 = sshll.u32 %s1264_s6, 4  ;;  %s792_s25 = int_to_ptr.vmem [resolvable:$true] %s791_s25  ;;  %s794_s28 = int_to_ptr.hbm [resolvable:$true] %s793_s28 }
  0x16   :  { %129 = vmatpush.msra.mxu1 %v1147_v7  ;;  %275 = vmatpush.msrb.mxu0 %v1135_v3 }
  0x17   :  { %v83_v8 = vld [vmem:[#allocation9] sm:$0xff]  ;;  %215 = vmatpush.msra.mxu3 %v1147_v7  ;;  %297 = vmatpush.msrb.mxu2 %v1133_v2 }
  0x18   :  { %814 = vmatmul.msk.f32.vlgmr.msra.gmra.mxu1 %vm73_vm0, %v83_v8  ;;  %276 = vmatpush.msrb.mxu0 %v1139_v4  ;;  %v84_v31 = vld [vmem:[#allocation11] sm:$0xff] }
  0x19   :  { %380 = vmatpush.msrb.mxu3 %v1131_v1  ;;  %359 = vmatpush.msrb.mxu1 %v1135_v3 }
  0x1a   :  { %298 = vmatpush.msrb.mxu2 %v1141_v5  ;;  %443 = vmatpush.msra.mxu0 %v1135_v3 }
  0x1b   :  { %381 = vmatpush.msrb.mxu3 %v1133_v2  ;;  %360 = vmatpush.msrb.mxu1 %v1139_v4 }
  0x1c   :  { %299 = vmatpush.msrb.mxu2 %v1147_v7  ;;  %444 = vmatpush.msra.mxu0 %v1139_v4 }
  0x1d   :  { %382 = vmatpush.msrb.mxu3 %v1141_v5  ;;  %527 = vmatpush.msra.mxu1 %v1135_v3 }
  0x1e   :  { %816 = vmatmul.msk.f32.vlgmr.msra.gmra.mxu2 %vm86_vm1, %v173_v30  ;;  %819 = vmatmul.msk.f32.vlgmr.msrb.gmra.mxu0 %vm86_vm1, %v257_v57 }
  0x1f   :  { %383 = vmatpush.msrb.mxu3 %v1147_v7  ;;  %528 = vmatpush.msra.mxu1 %v1139_v4 }
  0x20   :  { %464 = vmatpush.msra.mxu2 %v1131_v1  ;;  %611 = vmatpush.msrb.mxu0 %v1135_v3 }
  0x22   :  { %465 = vmatpush.msra.mxu2 %v1133_v2  ;;  %612 = vmatpush.msrb.mxu0 %v1139_v4 }
  0x24   :  { %466 = vmatpush.msra.mxu2 %v1141_v5 }
  0x26   :  { %467 = vmatpush.msra.mxu2 %v1147_v7 }
  0x91   :  { %v107_v9 = vpop.f32.mrf.mxu0 }
  0x95   :  { %v131_v11 = vpop.f32.mrf.mxu1 }
  0x96   :  { %v132_v12 = vadd.f32 %v131_v11, %v107_v9 }
  0x98   :  { %v137_v13 = vadd.f32 %v1176_v10, %v132_v12 }
  0x9a   :  { %v815_v14 = vmul.f32 -1.442695, %v137_v13 }
  0x9b   :  { %v278_v63 = vpop.f32.mrf.mxu0 }
  0x9c   :  { %849 = vpow2.f32 %v815_v14 }
  0xa1   :  { %v194_v37 = vpop.f32.mrf.mxu2 }
  0xa2   :  { %v850_v15 = vpop.eup %849 }
  0xa3   :  { %v141_v16 = vadd.f32 1.0, %v850_v15 }
  0xa5   :  { %851 = vrcp.f32 %v141_v16  ;;  %v153_v20 = vand.u32 2147483648, %v141_v16  ;;  %v151_v22 = vand.u32 2147483647, %v141_v16  ;;  %vm147_vm3 = vweird.f32 %v141_v16 }
  0xa6   :  { %853 = vtanh.f32 %v137_v13 }
  0xa7   :  { %v154_v24 = vor.u32 1.1754944e-38, %v153_v20  ;;  %vm152_vm5 = vcmp.eq.f32.partialorder %v151_v22, 8.507059e+37 }
  0xab   :  { %v852_v17 = vpop.eup %851 }
  0xac   :  { %v143_v18 = vmul.f32 %v852_v17, %v141_v16  ;;  %vm148_vm2 = vweird.f32 %v852_v17  ;;  %v854_v27 = vpop.eup %853 }
  0xad   :  { %vm149_vm4 = vmor %vm147_vm3, %vm148_vm2 }
  0xae   :  { %v144_v19 = vsub.f32 1.0, %v143_v18 }
  0xb0   :  { %v145_v21 = vmul.f32 %v852_v17, %v144_v19 }
  0xb2   :  { %v146_v23 = vadd.f32 %v852_v17, %v145_v21 }
  0xb4   :  { %v150_v25 = vsel %vm149_vm4, %v852_v17, %v146_v23 }
  0xb5   :  { %v155_v26 = vsel %vm152_vm5, %v154_v24, %v150_v25 }
  0xb6   :  { %160 = vrot.lane.b32.xlu0 %v155_v26, %s1071_s3  ;;  %v158_v32 = vmul.f32 %v155_v26, %v84_v31  ;;  %v341_v26 = vld [vmem:[#allocation2 + $0x18] sm:$0xff] }
  0xb7   :  { %822 = vmatmul.msk.f32.vlgmr.msrb.gmra.mxu1 %vm86_vm1, %v341_v26 }
  0xb8   :  { %695 = vmatpush.msrb.mxu1 %v1135_v3 }
  0xba   :  { %696 = vmatpush.msrb.mxu1 %v1139_v4 }
 0x128   :  { %v161_v28 = vpop.permute.xlu0 %160 }
 0x129   :  { %v163_v29 = vmul.f32 %v854_v27, %v161_v28 }
 0x12b   :  { %165 = vrot.lane.b32.xlu0 %v163_v29, %s1072_s13 }
 0x134   :  { %v362_v3 = vpop.f32.mrf.mxu1 }
 0x19d   :  { %v166_v33 = vpop.permute.xlu0 %165 }
 0x19e   :  { %v168_v34 = vadd.f32 %v166_v33, %v158_v32 }
 0x1a0   :  { %855 = vtanh.f32 %v168_v34 }
 0x1a6   :  { %v856_v35 = vpop.eup %855 }
 0x1a7   :  { %v170_v36 = vmul.f32 %v856_v35, %v161_v28 }
 0x1a9   :  { %171 = vst.msk [vmem:[#allocation8] sm:$0xff] %vm73_vm0, %v170_v36  ;;  %817 = vmatmul.msk.f32.vlgmr.msra.gmra.mxu3 %vm73_vm0, %v170_v36 }
 0x1aa   :  { %548 = vmatpush.msra.mxu3 %v1131_v1 }
 0x1ac   :  { %549 = vmatpush.msra.mxu3 %v1133_v2 }
 0x1ae   :  { %550 = vmatpush.msra.mxu3 %v1141_v5 }
 0x1b0   :  { %551 = vmatpush.msra.mxu3 %v1147_v7 }
 0x22c   :  { %v217_v38 = vpop.f32.mrf.mxu3 }
 0x22d   :  { %v218_v39 = vadd.f32 %v217_v38, %v194_v37 }
 0x22f   :  { %v220_v40 = vadd.f32 %v1176_v10, %v218_v39 }
 0x231   :  { %v818_v41 = vmul.f32 -1.442695, %v220_v40 }
 0x233   :  { %857 = vpow2.f32 %v818_v41 }
 0x239   :  { %v858_v42 = vpop.eup %857 }
 0x23a   :  { %v224_v43 = vadd.f32 1.0, %v858_v42 }
 0x23c   :  { %859 = vrcp.f32 %v224_v43  ;;  %v236_v47 = vand.u32 2147483648, %v224_v43  ;;  %v234_v49 = vand.u32 2147483647, %v224_v43  ;;  %vm230_vm7 = vweird.f32 %v224_v43 }
 0x23d   :  { %861 = vtanh.f32 %v220_v40 }
 0x23e   :  { %v237_v51 = vor.u32 1.1754944e-38, %v236_v47  ;;  %vm235_vm9 = vcmp.eq.f32.partialorder %v234_v49, 8.507059e+37 }
 0x242   :  { %v860_v44 = vpop.eup %859 }
 0x243   :  { %v226_v45 = vmul.f32 %v860_v44, %v224_v43  ;;  %vm231_vm6 = vweird.f32 %v860_v44  ;;  %v862_v54 = vpop.eup %861 }
 0x244   :  { %vm232_vm8 = vmor %vm230_vm7, %vm231_vm6 }
 0x245   :  { %v227_v46 = vsub.f32 1.0, %v226_v45 }
 0x247   :  { %v228_v48 = vmul.f32 %v860_v44, %v227_v46  ;;  %v425_v46 = vld [vmem:[#allocation2 + $0x20] sm:$0xff] }
 0x248   :  { %825 = vmatmul.msk.f32.vlgmr.msra.gmra.mxu0 %vm86_vm1, %v425_v46 }
 0x249   :  { %v229_v50 = vadd.f32 %v860_v44, %v228_v48 }
 0x24b   :  { %v233_v52 = vsel %vm232_vm8, %v860_v44, %v229_v50 }
 0x24c   :  { %v238_v53 = vsel %vm235_vm9, %v237_v51, %v233_v52 }
 0x24d   :  { %243 = vrot.lane.b32.xlu1 %v238_v53, %s1071_s3  ;;  %v241_v58 = vmul.f32 %v238_v53, %v168_v34 }
 0x2bf   :  { %v244_v55 = vpop.permute.xlu1 %243 }
 0x2c0   :  { %v246_v56 = vmul.f32 %v862_v54, %v244_v55 }
 0x2c2   :  { %248 = vrot.lane.b32.xlu1 %v246_v56, %s1072_s13 }
 0x2c5   :  { %v446_v52 = vpop.f32.mrf.mxu0 }
 0x334   :  { %v249_v59 = vpop.permute.xlu1 %248 }
 0x335   :  { %v251_v60 = vadd.f32 %v249_v59, %v241_v58 }
 0x337   :  { %863 = vtanh.f32 %v251_v60 }
 0x33d   :  { %v864_v61 = vpop.eup %863 }
 0x33e   :  { %v253_v62 = vmul.f32 %v864_v61, %v244_v55 }
 0x340   :  { %255 = vst.msk [vmem:[#allocation8 + $0x8] sm:$0xff] %vm73_vm0, %v253_v62  ;;  %820 = vmatmul.msk.f32.vlgmr.msrb.gmra.mxu2 %vm73_vm0, %v253_v62 }
 0x341   :  { %632 = vmatpush.msrb.mxu2 %v1131_v1 }
 0x343   :  { %633 = vmatpush.msrb.mxu2 %v1133_v2 }
 0x345   :  { %634 = vmatpush.msrb.mxu2 %v1141_v5 }
 0x347   :  { %635 = vmatpush.msrb.mxu2 %v1147_v7 }
 0x3c3   :  { %v301_v0 = vpop.f32.mrf.mxu2 }
 0x3c4   :  { %v302_v6 = vadd.f32 %v301_v0, %v278_v63 }
 0x3c6   :  { %v304_v8 = vadd.f32 %v1176_v10, %v302_v6 }
 0x3c8   :  { %v821_v9 = vmul.f32 -1.442695, %v304_v8 }
 0x3ca   :  { %865 = vpow2.f32 %v821_v9 }
 0x3d0   :  { %v866_v11 = vpop.eup %865 }
 0x3d1   :  { %v308_v12 = vadd.f32 1.0, %v866_v11 }
 0x3d3   :  { %867 = vrcp.f32 %v308_v12  ;;  %v320_v16 = vand.u32 2147483648, %v308_v12  ;;  %v318_v18 = vand.u32 2147483647, %v308_v12  ;;  %vm314_vm11 = vweird.f32 %v308_v12 }
 0x3d4   :  { %869 = vtanh.f32 %v304_v8 }
 0x3d5   :  { %v321_v20 = vor.u32 1.1754944e-38, %v320_v16  ;;  %vm319_vm13 = vcmp.eq.f32.partialorder %v318_v18, 8.507059e+37 }
 0x3d9   :  { %v868_v13 = vpop.eup %867 }
 0x3da   :  { %v310_v14 = vmul.f32 %v868_v13, %v308_v12  ;;  %vm315_vm10 = vweird.f32 %v868_v13  ;;  %v870_v23 = vpop.eup %869 }
 0x3db   :  { %vm316_vm12 = vmor %vm314_vm11, %vm315_vm10 }
 0x3dc   :  { %v311_v15 = vsub.f32 1.0, %v310_v14 }
 0x3de   :  { %v312_v17 = vmul.f32 %v868_v13, %v311_v15  ;;  %v509_v15 = vld [vmem:[#allocation2 + $0x28] sm:$0xff] }
 0x3df   :  { %828 = vmatmul.msk.f32.vlgmr.msra.gmra.mxu1 %vm86_vm1, %v509_v15 }
 0x3e0   :  { %v313_v19 = vadd.f32 %v868_v13, %v312_v17 }
 0x3e2   :  { %v317_v21 = vsel %vm316_vm12, %v868_v13, %v313_v19 }
 0x3e3   :  { %v322_v22 = vsel %vm319_vm13, %v321_v20, %v317_v21 }
 0x3e4   :  { %327 = vrot.lane.b32.xlu2 %v322_v22, %s1071_s3  ;;  %v325_v27 = vmul.f32 %v322_v22, %v251_v60 }
 0x43e   :  { %v328_v24 = vpop.permute.xlu2 %327 }
 0x43f   :  { %v330_v25 = vmul.f32 %v870_v23, %v328_v24 }
 0x441   :  { %332 = vrot.lane.b32.xlu2 %v330_v25, %s1072_s13 }
 0x45c   :  { %v530_v21 = vpop.f32.mrf.mxu1 }
 0x49b   :  { %v333_v28 = vpop.permute.xlu2 %332 }
 0x49c   :  { %v335_v29 = vadd.f32 %v333_v28, %v325_v27 }
 0x49e   :  { %871 = vtanh.f32 %v335_v29 }
 0x4a4   :  { %v872_v30 = vpop.eup %871 }
 0x4a5   :  { %v337_v31 = vmul.f32 %v872_v30, %v328_v24 }
 0x4a7   :  { %339 = vst.msk [vmem:[#allocation8 + $0x10] sm:$0xff] %vm73_vm0, %v337_v31  ;;  %823 = vmatmul.msk.f32.vlgmr.msrb.gmra.mxu3 %vm73_vm0, %v337_v31 }
 0x4a8   :  { %716 = vmatpush.msrb.mxu3 %v1131_v1 }
 0x4aa   :  { %717 = vmatpush.msrb.mxu3 %v1133_v2 }
 0x4ac   :  { %718 = vmatpush.msrb.mxu3 %v1141_v5 }
 0x4ae   :  { %719 = vmatpush.msrb.mxu3 %v1147_v7 }
 0x52a   :  { %v385_v4 = vpop.f32.mrf.mxu3 }
 0x52b   :  { %v386_v32 = vadd.f32 %v385_v4, %v362_v3 }
 0x52d   :  { %v388_v33 = vadd.f32 %v1176_v10, %v386_v32 }
 0x52f   :  { %v824_v34 = vmul.f32 -1.442695, %v388_v33 }
 0x531   :  { %873 = vpow2.f32 %v824_v34 }
 0x537   :  { %v874_v35 = vpop.eup %873 }
 0x538   :  { %v392_v36 = vadd.f32 1.0, %v874_v35 }
 0x53a   :  { %875 = vrcp.f32 %v392_v36  ;;  %v404_v1 = vand.u32 2147483648, %v392_v36  ;;  %v402_v2 = vand.u32 2147483647, %v392_v36  ;;  %vm398_vm15 = vweird.f32 %v392_v36 }
 0x53b   :  { %877 = vtanh.f32 %v388_v33 }
 0x53c   :  { %v405_v7 = vor.u32 1.1754944e-38, %v404_v1  ;;  %vm403_vm3 = vcmp.eq.f32.partialorder %v402_v2, 8.507059e+37 }
 0x540   :  { %v876_v37 = vpop.eup %875 }
 0x541   :  { %v394_v38 = vmul.f32 %v876_v37, %v392_v36  ;;  %vm399_vm14 = vweird.f32 %v876_v37  ;;  %v878_v43 = vpop.eup %877 }
 0x542   :  { %vm400_vm2 = vmor %vm398_vm15, %vm399_vm14 }
 0x543   :  { %v395_v39 = vsub.f32 1.0, %v394_v38 }
 0x545   :  { %v396_v40 = vmul.f32 %v876_v37, %v395_v39  ;;  %v593_v39 = vld [vmem:[#allocation2 + $0x30] sm:$0xff] }
 0x546   :  { %831 = vmatmul.msk.f32.vlgmr.msrb.gmra.mxu0 %vm86_vm1, %v593_v39 }
 0x547   :  { %v397_v5 = vadd.f32 %v876_v37, %v396_v40 }
 0x549   :  { %v401_v41 = vsel %vm400_vm2, %v876_v37, %v397_v5 }
 0x54a   :  { %v406_v42 = vsel %vm403_vm3, %v405_v7, %v401_v41 }
 0x54b   :  { %411 = vrot.lane.b32.xlu0 %v406_v42, %s1071_s3  ;;  %v409_v47 = vmul.f32 %v406_v42, %v335_v29 }
 0x5bd   :  { %v412_v44 = vpop.permute.xlu0 %411 }
 0x5be   :  { %v414_v45 = vmul.f32 %v878_v43, %v412_v44 }
 0x5c0   :  { %416 = vrot.lane.b32.xlu1 %v414_v45, %s1072_s13 }
 0x5c3   :  { %v614_v41 = vpop.f32.mrf.mxu0 }
 0x632   :  { %v417_v48 = vpop.permute.xlu1 %416 }
 0x633   :  { %v419_v49 = vadd.f32 %v417_v48, %v409_v47 }
 0x635   :  { %879 = vtanh.f32 %v419_v49 }
 0x63b   :  { %v880_v50 = vpop.eup %879 }
 0x63c   :  { %v421_v51 = vmul.f32 %v880_v50, %v412_v44 }
 0x63e   :  { %423 = vst.msk [vmem:[#allocation8 + $0x18] sm:$0xff] %vm73_vm0, %v421_v51  ;;  %826 = vmatmul.msk.f32.vlgmr.msra.gmra.mxu2 %vm73_vm0, %v421_v51 }
 0x6c1   :  { %v469_v53 = vpop.f32.mrf.mxu2 }
 0x6c2   :  { %v470_v54 = vadd.f32 %v469_v53, %v446_v52 }
 0x6c4   :  { %v472_v55 = vadd.f32 %v1176_v10, %v470_v54 }
 0x6c6   :  { %v827_v56 = vmul.f32 -1.442695, %v472_v55 }
 0x6c8   :  { %881 = vpow2.f32 %v827_v56 }
 0x6ce   :  { %v882_v57 = vpop.eup %881 }
 0x6cf   :  { %v476_v58 = vadd.f32 1.0, %v882_v57 }
 0x6d1   :  { %883 = vrcp.f32 %v476_v58  ;;  %v488_v62 = vand.u32 2147483648, %v476_v58  ;;  %v486_v0 = vand.u32 2147483647, %v476_v58  ;;  %vm482_vm5 = vweird.f32 %v476_v58 }
 0x6d2   :  { %885 = vtanh.f32 %v472_v55 }
 0x6d3   :  { %v489_v8 = vor.u32 1.1754944e-38, %v488_v62  ;;  %vm487_vm7 = vcmp.eq.f32.partialorder %v486_v0, 8.507059e+37 }
 0x6d7   :  { %v884_v59 = vpop.eup %883 }
 0x6d8   :  { %v478_v60 = vmul.f32 %v884_v59, %v476_v58  ;;  %vm483_vm4 = vweird.f32 %v884_v59  ;;  %v886_v12 = vpop.eup %885 }
 0x6d9   :  { %vm484_vm6 = vmor %vm482_vm5, %vm483_vm4 }
 0x6da   :  { %v479_v61 = vsub.f32 1.0, %v478_v60 }
 0x6dc   :  { %v480_v63 = vmul.f32 %v884_v59, %v479_v61  ;;  %v677_v61 = vld [vmem:[#allocation2 + $0x38] sm:$0xff] }
 0x6dd   :  { %834 = vmatmul.msk.f32.vlgmr.msrb.gmra.mxu1 %vm86_vm1, %v677_v61 }
 0x6de   :  { %v481_v6 = vadd.f32 %v884_v59, %v480_v63 }
 0x6e0   :  { %v485_v9 = vsel %vm484_vm6, %v884_v59, %v481_v6 }
 0x6e1   :  { %v490_v11 = vsel %vm487_vm7, %v489_v8, %v485_v9 }
 0x6e2   :  { %495 = vrot.lane.b32.xlu2 %v490_v11, %s1071_s3  ;;  %v493_v16 = vmul.f32 %v490_v11, %v419_v49 }
 0x73c   :  { %v496_v13 = vpop.permute.xlu2 %495 }
 0x73d   :  { %v498_v14 = vmul.f32 %v886_v12, %v496_v13 }
 0x73f   :  { %500 = vrot.lane.b32.xlu0 %v498_v14, %s1072_s13 }
 0x75a   :  { %v698_v9 = vpop.f32.mrf.mxu1 }
 0x7b1   :  { %v501_v17 = vpop.permute.xlu0 %500 }
 0x7b2   :  { %v503_v18 = vadd.f32 %v501_v17, %v493_v16 }
 0x7b4   :  { %887 = vtanh.f32 %v503_v18 }
 0x7ba   :  { %v888_v19 = vpop.eup %887 }
 0x7bb   :  { %v505_v20 = vmul.f32 %v888_v19, %v496_v13 }
 0x7bd   :  { %507 = vst.msk [vmem:[#allocation8 + $0x20] sm:$0xff] %vm73_vm0, %v505_v20  ;;  %829 = vmatmul.msk.f32.vlgmr.msra.gmra.mxu3 %vm73_vm0, %v505_v20 }
 0x840   :  { %v553_v22 = vpop.f32.mrf.mxu3 }
 0x841   :  { %v554_v23 = vadd.f32 %v553_v22, %v530_v21 }
 0x843   :  { %v556_v24 = vadd.f32 %v1176_v10, %v554_v23 }
 0x845   :  { %v830_v25 = vmul.f32 -1.442695, %v556_v24 }
 0x847   :  { %889 = vpow2.f32 %v830_v25 }
 0x84d   :  { %v890_v26 = vpop.eup %889 }
 0x84e   :  { %v560_v27 = vadd.f32 1.0, %v890_v26 }
 0x850   :  { %891 = vrcp.f32 %v560_v27  ;;  %v572_v31 = vand.u32 2147483648, %v560_v27  ;;  %v570_v4 = vand.u32 2147483647, %v560_v27  ;;  %vm566_vm9 = vweird.f32 %v560_v27 }
 0x851   :  { %893 = vtanh.f32 %v556_v24 }
 0x852   :  { %v573_v33 = vor.u32 1.1754944e-38, %v572_v31  ;;  %vm571_vm11 = vcmp.eq.f32.partialorder %v570_v4, 8.507059e+37 }
 0x856   :  { %v892_v28 = vpop.eup %891 }
 0x857   :  { %v562_v29 = vmul.f32 %v892_v28, %v560_v27  ;;  %vm567_vm8 = vweird.f32 %v892_v28  ;;  %v894_v36 = vpop.eup %893 }
 0x858   :  { %vm568_vm10 = vmor %vm566_vm9, %vm567_vm8 }
 0x859   :  { %v563_v30 = vsub.f32 1.0, %v562_v29 }
 0x85b   :  { %v564_v3 = vmul.f32 %v892_v28, %v563_v30 }
 0x85d   :  { %v565_v32 = vadd.f32 %v892_v28, %v564_v3 }
 0x85f   :  { %v569_v34 = vsel %vm568_vm10, %v892_v28, %v565_v32 }
 0x860   :  { %v574_v35 = vsel %vm571_vm11, %v573_v33, %v569_v34 }
 0x861   :  { %579 = vrot.lane.b32.xlu1 %v574_v35, %s1071_s3  ;;  %v577_v1 = vmul.f32 %v574_v35, %v503_v18 }
 0x8d3   :  { %v580_v37 = vpop.permute.xlu1 %579 }
 0x8d4   :  { %v582_v38 = vmul.f32 %v894_v36, %v580_v37 }
 0x8d6   :  { %584 = vrot.lane.b32.xlu2 %v582_v38, %s1072_s13 }
 0x930   :  { %v585_v40 = vpop.permute.xlu2 %584 }
 0x931   :  { %v587_v2 = vadd.f32 %v585_v40, %v577_v1 }
 0x933   :  { %895 = vtanh.f32 %v587_v2 }
 0x939   :  { %v896_v5 = vpop.eup %895 }
 0x93a   :  { %v589_v7 = vmul.f32 %v896_v5, %v580_v37 }
 0x93c   :  { %591 = vst.msk [vmem:[#allocation8 + $0x28] sm:$0xff] %vm73_vm0, %v589_v7  ;;  %832 = vmatmul.msk.f32.vlgmr.msrb.gmra.mxu2 %vm73_vm0, %v589_v7 }
 0x9bf   :  { %v637_v42 = vpop.f32.mrf.mxu2 }
 0x9c0   :  { %v638_v43 = vadd.f32 %v637_v42, %v614_v41 }
 0x9c2   :  { %v640_v44 = vadd.f32 %v1176_v10, %v638_v43 }
 0x9c4   :  { %v833_v45 = vmul.f32 -1.442695, %v640_v44 }
 0x9c6   :  { %897 = vpow2.f32 %v833_v45 }
 0x9cc   :  { %v898_v46 = vpop.eup %897 }
 0x9cd   :  { %v644_v47 = vadd.f32 1.0, %v898_v46 }
 0x9cf   :  { %899 = vrcp.f32 %v644_v47  ;;  %v656_v51 = vand.u32 2147483648, %v644_v47  ;;  %v654_v53 = vand.u32 2147483647, %v644_v47  ;;  %vm650_vm13 = vweird.f32 %v644_v47 }
 0x9d0   :  { %901 = vtanh.f32 %v640_v44 }
 0x9d1   :  { %v657_v55 = vor.u32 1.1754944e-38, %v656_v51  ;;  %vm655_vm15 = vcmp.eq.f32.partialorder %v654_v53, 8.507059e+37 }
 0x9d5   :  { %v900_v48 = vpop.eup %899 }
 0x9d6   :  { %v646_v49 = vmul.f32 %v900_v48, %v644_v47  ;;  %vm651_vm12 = vweird.f32 %v900_v48  ;;  %v902_v58 = vpop.eup %901 }
 0x9d7   :  { %vm652_vm14 = vmor %vm650_vm13, %vm651_vm12 }
 0x9d8   :  { %v647_v50 = vsub.f32 1.0, %v646_v49 }
 0x9da   :  { %v648_v52 = vmul.f32 %v900_v48, %v647_v50 }
 0x9dc   :  { %v649_v54 = vadd.f32 %v900_v48, %v648_v52 }
 0x9de   :  { %v653_v56 = vsel %vm652_vm14, %v900_v48, %v649_v54 }
 0x9df   :  { %v658_v57 = vsel %vm655_vm15, %v657_v55, %v653_v56 }
 0x9e0   :  { %663 = vrot.lane.b32.xlu0 %v658_v57, %s1071_s3  ;;  %v661_v62 = vmul.f32 %v658_v57, %v587_v2 }
 0xa52   :  { %v664_v59 = vpop.permute.xlu0 %663 }
 0xa53   :  { %v666_v60 = vmul.f32 %v902_v58, %v664_v59 }
 0xa55   :  { %668 = vrot.lane.b32.xlu1 %v666_v60, %s1072_s13 }
 0xac7   :  { %v669_v63 = vpop.permute.xlu1 %668 }
 0xac8   :  { %v671_v0 = vadd.f32 %v669_v63, %v661_v62 }
 0xaca   :  { %903 = vtanh.f32 %v671_v0 }
 0xad0   :  { %v904_v6 = vpop.eup %903 }
 0xad1   :  { %v673_v8 = vmul.f32 %v904_v6, %v664_v59 }
 0xad3   :  { %675 = vst.msk [vmem:[#allocation8 + $0x30] sm:$0xff] %vm73_vm0, %v673_v8  ;;  %835 = vmatmul.msk.f32.vlgmr.msrb.gmra.mxu3 %vm73_vm0, %v673_v8 }
 0xb56   :  { %v721_v11 = vpop.f32.mrf.mxu3 }
 0xb57   :  { %v722_v12 = vadd.f32 %v721_v11, %v698_v9 }
 0xb59   :  { %v724_v13 = vadd.f32 %v1176_v10, %v722_v12 }
 0xb5b   :  { %v836_v14 = vmul.f32 -1.442695, %v724_v13 }
 0xb5d   :  { %905 = vpow2.f32 %v836_v14 }
 0xb63   :  { %v906_v15 = vpop.eup %905 }
 0xb64   :  { %v728_v16 = vadd.f32 1.0, %v906_v15 }
 0xb66   :  { %907 = vrcp.f32 %v728_v16  ;;  %v740_v20 = vand.u32 2147483648, %v728_v16  ;;  %v738_v22 = vand.u32 2147483647, %v728_v16  ;;  %vm734_vm2 = vweird.f32 %v728_v16 }
 0xb67   :  { %909 = vtanh.f32 %v724_v13 }
 0xb68   :  { %v741_v24 = vor.u32 1.1754944e-38, %v740_v20  ;;  %vm739_vm4 = vcmp.eq.f32.partialorder %v738_v22, 8.507059e+37 }
 0xb6c   :  { %v908_v17 = vpop.eup %907 }
 0xb6d   :  { %v730_v18 = vmul.f32 %v908_v17, %v728_v16  ;;  %vm735_vm1 = vweird.f32 %v908_v17  ;;  %v910_v10 = vpop.eup %909 }
 0xb6e   :  { %vm736_vm3 = vmor %vm734_vm2, %vm735_vm1 }
 0xb6f   :  { %v731_v19 = vsub.f32 1.0, %v730_v18 }
 0xb71   :  { %v732_v21 = vmul.f32 %v908_v17, %v731_v19 }
 0xb73   :  { %v733_v23 = vadd.f32 %v908_v17, %v732_v21 }
 0xb75   :  { %v737_v25 = vsel %vm736_vm3, %v908_v17, %v733_v23 }
 0xb76   :  { %v742_v26 = vsel %vm739_vm4, %v741_v24, %v737_v25 }
 0xb77   :  { %747 = vrot.lane.b32.xlu2 %v742_v26, %s1071_s3  ;;  %v745_v29 = vmul.f32 %v742_v26, %v671_v0 }
 0xbd1   :  { %v748_v27 = vpop.permute.xlu2 %747 }
 0xbd2   :  { %v750_v28 = vmul.f32 %v910_v10, %v748_v27 }
 0xbd4   :  { %752 = vrot.lane.b32.xlu0 %v750_v28, %s1072_s13 }
 0xc46   :  { %v753_v30 = vpop.permute.xlu0 %752 }
 0xc47   :  { %v755_v31 = vadd.f32 %v753_v30, %v745_v29 }
 0xc49   :  { %911 = vtanh.f32 %v755_v31  ;;  %761 = vst.msk [vmem:[#allocation11] sm:$0xff] %vm73_vm0, %v755_v31 }
 0xc4f   :  { %v912_v3 = vpop.eup %911 }
 0xc50   :  { %v757_v4 = vmul.f32 %v912_v3, %v748_v27 }
 0xc52   :  { %759 = vst.msk [vmem:[#allocation8 + $0x38] sm:$0xff] %vm73_vm0, %v757_v4 }
 0xc53   :  { %760 = vst.msk [vmem:[#allocation9] sm:$0xff] %vm73_vm0, %v757_v4  ;;  %774 = dma.vmem_to_hbm [thread:$0]  %s767_s15, 1024, %s769_s18, [#allocation4], %s1066_s29, %s1066_s29, %s1067_s30  }
 0xc54   :  { %785 = dma.vmem_to_hbm [thread:$0]  %s781_s20, 128, %s783_s23, [#allocation10]  }
 0xc55   :  { %796 = dma.vmem_to_hbm [thread:$0]  %s792_s25, 128, %s794_s28, [#allocation10]  }
 0xc56   :  { %1061 = dma.done.wait [#allocation4], 1024  }
 0xc57   :  { %1062 = vsyncadd [#allocation4], 4294966272 }
 0xc58   :  { %1063 = dma.done.wait [#allocation10], 256  }
 0xc59   :  { %1064 = vsyncadd [#allocation10], 4294967040 }
 0xc5a   :  { %809 = vsyncpa [#allocation3], 1 }
 0xc5b   :  { %810 = vsyncpa [#allocation6], 1 }
 0xc5c   :  { %811 = vsyncpa [#allocation4], 1 }
 0xc5d   :  { %812 = vsyncpa [#allocation10], 1 }

</bundles_post_ra>
